<compile_context>
chip_gen: v7x
topology: tpu7x:2x2x1
jax: 0.10.0
libtpu: 0.0.40
codegen_flags: <defaults>
</compile_context>

<pallas_src>
import functools

import jax
import jax.numpy as jnp
from jax.experimental import pallas as pl
from jax.experimental.pallas import tpu as pltpu


def _copy_kernel(x_ref, o_ref):
    # Lane-dense, unmasked copy: both blocks have identical shapes.
    o_ref[...] = x_ref[...]


def _copy_slice_kernel(x_ref, o_ref, *, l_out):
    # Small-shape fallback: whole (1, C, L) block per batch element, slice in VMEM.
    o_ref[...] = x_ref[:, :, :l_out]


def _sublane_multiple(dtype) -> int:
    # f32 -> 8 sublanes, bf16 -> 16, int8/fp8 -> 32 (sub-32-bit dtypes pack along sublanes).
    return max(8, 32 // jnp.dtype(dtype).itemsize)


def chomp1d(x: jax.Array, chomp_size: int) -> jax.Array:
    """Pallas equivalent of Chomp1d(chomp_size).forward(x) for x of shape (N, C, L)."""
    n, c, l = x.shape
    assert 0 < chomp_size < l, "chomp_size must be in (0, L)"
    l_out = l - chomp_size
    itemsize = jnp.dtype(x.dtype).itemsize

    # -------- small-shape fallback (l_out < 128) --------------------------------------
    if l_out < 128:
        kernel = functools.partial(_copy_slice_kernel, l_out=l_out)
        return pl.pallas_call(
            kernel,
            out_shape=jax.ShapeDtypeStruct((n, c, l_out), x.dtype),
            grid_spec=pltpu.PrefetchScalarGridSpec(
                num_scalar_prefetch=0,
                grid=(n,),
                # Last two block dims equal the full array dims, satisfying the
                # (8, 128) tiling rule for small shapes.
                in_specs=[pl.BlockSpec((1, c, l), lambda i: (i, 0, 0))],
                out_specs=pl.BlockSpec((1, c, l_out), lambda i: (i, 0, 0)),
            ),
            compiler_params=pltpu.CompilerParams(
                dimension_semantics=("parallel",),
            ),
        )(x)

    # -------- tiled fast path ----------------------------------------------------------
    # Channel tile: multiple of the sublane packing (8/16/32), capped at 256; if C is not
    # a clean multiple, the full channel dim is always a legal block dim.
    sub = _sublane_multiple(x.dtype)
    tc = min(c, 256) if c % sub == 0 else c

    # Lane tile: multiple of 128, target <= 2048 lanes (measured sweet spot for
    # mem-bound copies); a single tile if the whole kept length fits.
    tl = min(2048, pl.cdiv(l_out, 128) * 128)

    # Keep double-buffered in+out footprint (2 bufs x (in_tile + out_tile)) within
    # ~12 MiB so the default scoped-VMEM limit works on every TPU generation.
    budget_bytes = 12 * 1024 * 1024
    while tl > 128 and 4 * tc * tl * itemsize > budget_bytes:
        tl -= 128

    grid = (n, pl.cdiv(c, tc), pl.cdiv(l_out, tl))
    block = (1, tc, tl)
    index_map = lambda i, j, k: (i, j, k)

    return pl.pallas_call(
        _copy_kernel,
        out_shape=jax.ShapeDtypeStruct((n, c, l_out), x.dtype),
        grid_spec=pltpu.PrefetchScalarGridSpec(
            num_scalar_prefetch=0,
            grid=grid,
            # Both specs walk the kept region only. The last L-tile may read a few
            # elements of the chomped tail (or Pallas padding), but the output store
            # is masked to l_out, so results stay exact.
            in_specs=[pl.BlockSpec(block, index_map)],
            out_specs=pl.BlockSpec(block, index_map),
        ),
        compiler_params=pltpu.CompilerParams(
            # Pure copy, no reduction axis: all grid axes are independent, which lets
            # the v7x megacore shard (N, C-tiles, L-tiles) across both TensorCores.
            dimension_semantics=("parallel", "parallel", "parallel"),
        ),
    )(x)


if __name__ == "__main__":
    key = jax.random.PRNGKey(0)
    k1, k2 = jax.random.split(key)

    # 1) Small NCL input as in the module's typical TCN usage (small-shape path).
    chomp_size = 3
    N, C, L = 2, 4, 16
    x = jax.random.normal(k1, (N, C, L), dtype=jnp.float32)

    y = jax.block_until_ready(chomp1d(x, chomp_size))
    y_ref = x[:, :, :-chomp_size]
    assert y.shape == (N, C, L - chomp_size), y.shape
    assert y.dtype == x.dtype
    assert jnp.array_equal(y, y_ref), "mismatch vs reference slice (small path)"

    # 2) Slightly larger input that exercises the lane-dense tiled fast path.
    chomp2 = 2
    N2, C2, L2 = 2, 8, 256
    x2 = jax.random.normal(k2, (N2, C2, L2), dtype=jnp.float32)

    y2 = jax.block_until_ready(chomp1d(x2, chomp2))
    y2_ref = x2[:, :, :-chomp2]
    assert y2.shape == (N2, C2, L2 - chomp2), y2.shape
    assert jnp.array_equal(y2, y2_ref), "mismatch vs reference slice (tiled path)"

    print("KERNEL_OK")
</pallas_src>

<mosaic_0001>
module attributes {stable_mosaic.version = 11 : i64} {
  func.func @_copy_slice_kernel(%arg0: i32, %arg1: memref<1x4x16xf32, #tpu.memory_space<vmem>>, %arg2: memref<1x4x13xf32, #tpu.memory_space<vmem>>) attributes {dimension_semantics = [#tpu.dimension_semantics<parallel>], iteration_bounds = array<i64: 2>, scalar_prefetch = 0 : i64, scratch_operands = 0 : i64, tpu.core_type = #tpu.core_type<tc>, window_params = [{transform_indices = @transform_0, window_bounds = array<i64: 1, 4, 16>}, {transform_indices = @transform_1, window_bounds = array<i64: 1, 4, 13>}]} {
    %c0 = arith.constant 0 : index
    %c0_0 = arith.constant 0 : index
    %c0_1 = arith.constant 0 : index
    %0 = vector.load %arg1[%c0, %c0_0, %c0_1] : memref<1x4x16xf32, #tpu.memory_space<vmem>>, vector<1x4x13xf32>
    %c0_2 = arith.constant 0 : index
    %c0_3 = arith.constant 0 : index
    %c0_4 = arith.constant 0 : index
    %1 = vector.load %arg2[%c0_2, %c0_3, %c0_4] : memref<1x4x13xf32, #tpu.memory_space<vmem>>, vector<1x4x13xf32>
    tpu.vector_store %arg2[%c0_2, %c0_3, %c0_4], %0 {strides = array<i32>} : memref<1x4x13xf32, #tpu.memory_space<vmem>>, vector<1x4x13xf32>,
    return
  }
  func.func @transform_0(%arg0: i32) -> (i32, i32, i32) {
    %c0_i32 = arith.constant 0 : i32
    %c0_i32_0 = arith.constant 0 : i32
    %c0_i32_1 = arith.constant 0 : i32
    return %arg0, %c0_i32, %c0_i32_0 : i32, i32, i32
  }
  func.func @transform_1(%arg0: i32) -> (i32, i32, i32) {
    %c0_i32 = arith.constant 0 : i32
    %c0_i32_0 = arith.constant 0 : i32
    %c0_i32_1 = arith.constant 0 : i32
    return %arg0, %c0_i32, %c0_i32_0 : i32, i32, i32
  }
}

</mosaic_0001>

<bundles_post_ra>
// kernel: tpu_custom_call.1
= control target key start
LH: loop header
LB: loop body
LE: loop exit
PB: predicated region body
PF: predicated region fallthrough
CT: control target
= control target key end

     0   :  { %6 = vsyncpa [#allocation3], 0  ;;  %s548_s0 = inlined_call_operand.hbm [shape: f32[2,4,16], index: 0, kind: input, shape index: {}]   ;;  %s549_s1 = inlined_call_operand.hbm [shape: f32[2,4,13], index: 1, kind: output, shape index: {}]  }
   0x1   :  { %8 = vsyncpa [#allocation3 + $0x1], 0 }
   0x2   :  { %9 = vsyncpa [#allocation4], 0 }
   0x3   :  { %11 = vsyncpa [#allocation4 + $0x1], 0  ;;  %s387_s6 = smov 0   ;;  %s389_s7 = smov 0  }
   0x4   :  { %s391_s8 = smov 0   ;;  %s393_s9 = smov 0  }
   0x5 LB: > { %s408_s10 = sadd.s32 4294967295, %s373_s9   ;;  %s219_s11 = sadd.s32 4294967294, %s373_s9   ;;  %s373_s9 = sphi %s393_s9, %s564_s9   ;;  %s369_s8 = sphi %s391_s8, %s563_s8   ;;  %s365_s7 = sphi %s389_s7, %s562_s7   ;;  %s361_s6 = sphi %s387_s6, %s561_s6  }
   0x6   : > { %s412_s12 = sadd.s32 1, %s373_s9   ;;  %s24_s13 = sadd.s32 1, %s369_s8 }
   0x7   : > { %s21_s14 = ssub.s32 %s373_s9, %s412_s12  ;;  %p31_p0 = scmp.ne.s32.totalorder %s369_s8, %s365_s7 }
   0x8   : > { %p22_p1 = scmp.eq.s32.totalorder %s21_s14, 0  ;;  %p32_p2 = scmp.eq.s32.totalorder %s373_s9, 0 }
   0x9   : > { %p37_p3 = scmp.ne.s32.totalorder %s365_s7, %s361_s6  ;;  %p38_p4 = scmp.eq.s32.totalorder %s408_s10, 0 }
   0xa   : > { %s424_s15 = scalar_select %p22_p1, %s369_s8, %s24_s13  }
   0xb   : > { %p426_p5 = por %p32_p2, %p31_p0  ;;  %p430_p6 = por %p38_p4, %p37_p3 }
   0xc   : > { %p61_p7 = scmp.eq.s32.totalorder %s408_s10, 1  ;;  %p67_p8 = scmp.eq.s32.totalorder %s219_s11, 1 }
   0xd   : > { %p243_p10 = scmp.lt.s32.totalorder %s373_s9, 2  ;;  %s87_s20 = sand.u32 1, %s369_s8  }
   0xe   : > { %p437_p11 = por %p61_p7, %p31_p0  ;;  %p441_p12 = por %p67_p8, %p37_p3 }
   0xf   : > { %s223_s21 = sshll.u32 %s373_s9, 6  ;;  %s222_s22 = sshll.u32 %s87_s20, 2 }
  0x10   : > { %s553_s18 = scalar_select %p437_p11, 1, 0 }
  0x11   : > { %s554_s19 = scalar_select %p441_p12, 1, 0 }
  0x12   : > { %s450_s25 = scalar_lea.hbm %s548_s0, %s223_s21  ;;  %s91_s26 = scalar_lea.vmem [#allocation2], %s222_s22 }
  0x13   : > { %s98_s27 = sshll.u32 %s91_s26, 4  ;;  %p454_p13 = pnand %p243_p10, %p426_p5  ;;  %s458_s27 = int_to_ptr.vmem [resolvable:$true] %s98_s27 }
  0x14   : > { %s88_s29 = scalar_lea.sflag [#allocation3], %s87_s20  ;;  %s277_s30 = scalar_lea.hbm %s450_s25, 64 }
  0x15   : > { %p278_p2 = scmp.ne.s32.totalorder %s450_s25, %s277_s30  ;;  %p279_p3 = pneg %p454_p13 }
  0x16   : > { %s282_s4 = scalar_lea.hbm %s548_s0, 128  ;;  %p283_p5 = scmp.lt.u32.totalorder %s450_s25, %s548_s0 }
  0x17   : > { %p280_p4 = pnand %p279_p3, %p278_p2  ;;  %p284_p8 = scmp.lt.u32.totalorder %s282_s4, %s277_s30 }
  0x18   : > { %p286_p9 = scmp.lt.u32.totalorder %s277_s30, %s450_s25 }
  0x19   : > { %p281_p7 = pneg %p280_p4  ;;  %p285_p10 = por %p284_p8, %p283_p5 }
  0x1b   : > { %p287_p0 = por %p286_p9, %p285_p10 }
  0x1d   : > { %p288_p1 = pnand %p287_p0, %p281_p7 }
  0x1f   : > { %291 = shalt.err (!%p288_p1)
}
  0x20   : > { %s292_s13 = scalar_lea.vmem %s458_s27, 64  ;;  %s375_s14 = smov [#allocation2]  }
  0x21   : > { %p293_p2 = scmp.ne.s32.totalorder %s458_s27, %s292_s13  ;;  %s297_s16 = sshll.u32 %s375_s14, 4  ;;  %s298_s16 = int_to_ptr.vmem [resolvable:$false] %s297_s16 }
  0x22   : > { %s299_s20 = scalar_lea.vmem %s298_s16, 128  ;;  %p300_p11 = scmp.lt.s32.totalorder %s458_s27, %s298_s16 }
  0x23   : > { %p295_p4 = pnand %p293_p2, %p279_p3  ;;  %p301_p5 = scmp.lt.s32.totalorder %s299_s20, %s292_s13 }
  0x25   : > { %p296_p12 = pneg %p295_p4  ;;  %p302_p8 = por %p301_p5, %p300_p11 }
  0x27   : > { %p303_p9 = pnand %p302_p8, %p296_p12 }
  0x29   : > { %306 = shalt.err (!%p303_p9)
}
  0x2a   : > { %238 = dma.hbm_to_vmem [thread:$0]  (!%p454_p13), %s450_s25, 64, %s458_s27, %s88_s29  }
  0x2b   : > { %p556_p0 = scmp.lt.s32.totalorder %s373_s9, 3  ;;  %p557_p1 = scmp.ge.s32.totalorder %s373_s9, 1 }
  0x2d   : > { %p104_p3 = pnand %p557_p1, %p556_p0 }
  0x2e   : > { %s492_s21 = sand.u32 (!%p104_p3), 1, %s365_s7  }
  0x2f   : > { %107 = sbr.rel (%p104_p3) target bundleno = 81 (0x51), region = 24  ;;  %s225_s22 = sshll.u32 (!%p104_p3), %s492_s21, 2 }
  0x30   : > { %s110_s23 = scalar_lea.sflag (!%p104_p3), [#allocation3], %s492_s21  ;;  %s113_s24 = scalar_lea.vmem (!%p104_p3), [#allocation2], %s225_s22 }
  0x36   : > { %352 = dma.done.wait (%p430_p6), %s110_s23, 64  }
  0x37   : > { %354 = vsyncadd (%p430_p6), %s110_s23, 4294967232  ;;  %s131_s25 = scalar_lea.vmem [#allocation5], %s225_s22  ;;  %s228_s27 = sshll.u32 %s408_s10, 6  ;;  %vm133_vm0 = vcmask 101376   ;;  %v132_v0 = vld [vmem:[%s113_s24] sm:$0xf] }
  0x38   : > { %s149_s26 = sshll.u32 %s131_s25, 4  ;;  %s506_s30 = scalar_lea.hbm %s549_s1, %s228_s27  ;;  %134 = vst.msk [vmem:[%s131_s25] sm:$0xf] %vm133_vm0, %v132_v0  ;;  %s501_s26 = int_to_ptr.vmem [resolvable:$true] %s149_s26 }
  0x39   : > { %s136_s17 = scalar_lea.sflag [#allocation4], %s492_s21  ;;  %s307_s2 = scalar_lea.vmem %s501_s26, 64 }
  0x3a   : > { %p308_p6 = scmp.ne.s32.totalorder %s501_s26, %s307_s2  ;;  %p558_p11 = scmp.ne.s32.totalorder %s553_s18, 0 }
  0x3b   : > { %s376_s10 = smov [#allocation5]  }
  0x3c   : > { %p309_p12 = pnand %p308_p6, %p558_p11  ;;  %s311_s3 = sshll.u32 %s376_s10, 4  ;;  %s312_s3 = int_to_ptr.vmem [resolvable:$false] %s311_s3 }
  0x3d   : > { %s313_s4 = scalar_lea.vmem %s312_s3, 128  ;;  %p314_p7 = scmp.lt.s32.totalorder %s501_s26, %s312_s3 }
  0x3e   : > { %p310_p13 = pneg %p309_p12  ;;  %p315_p10 = scmp.lt.s32.totalorder %s313_s4, %s307_s2 }
  0x40   : > { %p316_p2 = por %p315_p10, %p314_p7 }
  0x42   : > { %p317_p4 = pnand %p316_p2, %p310_p13 }
  0x44   : > { %320 = shalt.err (!%p317_p4)
}
  0x45   : > { %s321_s5 = scalar_lea.hbm %s506_s30, 64  ;;  %s325_s14 = scalar_lea.hbm %s549_s1, 128 }
  0x46   : > { %p322_p5 = scmp.ne.s32.totalorder %s506_s30, %s321_s5  ;;  %p326_p0 = scmp.lt.u32.totalorder %s506_s30, %s549_s1 }
  0x47   : > { %p327_p1 = scmp.lt.u32.totalorder %s325_s14, %s321_s5  ;;  %p329_p6 = scmp.lt.u32.totalorder %s321_s5, %s506_s30 }
  0x48   : > { %p323_p8 = pnand %p322_p5, %p558_p11 }
  0x49   : > { %p328_p3 = por %p327_p1, %p326_p0 }
  0x4a   : > { %p324_p9 = pneg %p323_p8 }
  0x4b   : > { %p330_p12 = por %p329_p6, %p328_p3 }
  0x4d   : > { %p331_p13 = pnand %p330_p12, %p324_p9 }
  0x4f   : > { %334 = shalt.err (!%p331_p13)
}
  0x50   : > { %233 = dma.vmem_to_hbm [thread:$0]  (%p558_p11), %s501_s26, 64, %s506_s30, %s136_s17  }
  0x51 PF: > { %s161_s21 = sand.u32 1, %s361_s6   ;;  %p559_p7 = scmp.ne.s32.totalorder %s554_s19, 0 }
  0x52   : > { %p560_p10 = scmp.ge.s32.totalorder %s373_s9, 2  ;;  %s162_s22 = scalar_lea.sflag [#allocation4], %s161_s21 }
  0x54   : > { %p240_p2 = pnand %p560_p10, %p559_p7 }
  0x56   : > { %356 = dma.done.wait (!%p240_p2), %s162_s22, 64  }
  0x57   : > { %358 = vsyncadd (!%p240_p2), %s162_s22, 4294967232  ;;  %p14_p4 = scmp.ge.s32.totalorder %s412_s12, 4   ;;  %s561_s6 = smov %s365_s7 }
  0x58   : > { %s562_s7 = smov %s369_s8  ;;  %s563_s8 = smov %s424_s15 }
  0x59   : > { %s564_s9 = smov %s412_s12  ;;  %16 = sbr.rel (!%p14_p4) target bundleno = 5 (0x5), region = 69 }
  0x60   :  { %167 = vsyncpa [#allocation3], 1 }
  0x61   :  { %169 = vsyncpa [#allocation3 + $0x1], 1 }
  0x62   :  { %170 = vsyncpa [#allocation4], 1 }
  0x63   :  { %172 = vsyncpa [#allocation4 + $0x1], 1 }

</bundles_post_ra>
